<compile_context>
chip_gen: v7x
topology: tpu7x:2x2x1
jax: 0.10.0
libtpu: 0.0.40
codegen_flags: <defaults>
</compile_context>

<pallas_src>
import functools

import jax
import jax.numpy as jnp
from jax.experimental import pallas as pl
from jax.experimental.pallas import tpu as pltpu


# ----------------------------------------------------------------------------
# Conv-as-GEMM Pallas kernel (fused bias + optional ReLU)
# ----------------------------------------------------------------------------
def _conv_gemm_kernel(w_ref, b_ref, p_ref, o_ref, *, apply_relu):
    # w_ref: (Cout, K)      bf16, resident
    # b_ref: (Cout, 1)      f32,  resident
    # p_ref: (K, TILE_M)    bf16, im2col patches (spatial on the lane axis)
    # o_ref: (Cout, TILE_M) lane-dense output tile
    acc = jnp.dot(w_ref[...], p_ref[...], preferred_element_type=jnp.float32)
    acc = acc + b_ref[...]                      # f32 bias broadcast over lanes
    if apply_relu:
        acc = jnp.maximum(acc, 0.0)
    o_ref[...] = acc.astype(o_ref.dtype)


def _conv_gemm(patches, w2d, b2d, apply_relu, out_dtype, tile_m_max=1024):
    """out[n, :, m] = act(W @ patches[n, :, m] + b); patches: (N, K, M) bf16."""
    N, K, M = patches.shape
    Cout = w2d.shape[0]

    # Pad M up to a lane-dense multiple of 128 and pick a large M tile.
    m_pad = max(128, ((M + 127) // 128) * 128)
    tile_m = min(m_pad, tile_m_max)
    m_pad = ((m_pad + tile_m - 1) // tile_m) * tile_m
    if m_pad != M:
        patches = jnp.pad(patches, ((0, 0), (0, 0), (0, m_pad - M)))

    grid = (N, m_pad // tile_m)

    out = pl.pallas_call(
        functools.partial(_conv_gemm_kernel, apply_relu=apply_relu),
        out_shape=jax.ShapeDtypeStruct((N, Cout, m_pad), out_dtype),
        grid_spec=pltpu.PrefetchScalarGridSpec(
            num_scalar_prefetch=0,
            grid=grid,
            in_specs=[
                pl.BlockSpec((Cout, K), lambda n, m: (0, 0)),           # resident W
                pl.BlockSpec((Cout, 1), lambda n, m: (0, 0)),           # resident b
                pl.BlockSpec((None, K, tile_m), lambda n, m: (n, 0, m)),  # patches
            ],
            out_specs=pl.BlockSpec((None, Cout, tile_m), lambda n, m: (n, 0, m)),
        ),
        compiler_params=pltpu.CompilerParams(
            dimension_semantics=("parallel", "parallel"),
        ),
    )(w2d, b2d, patches)
    return out[:, :, :M]


def _conv3x3(x, w, b, stride, apply_relu, out_dtype):
    """3x3 conv, padding=1, NCHW in / NCHW out, via im2col + Pallas GEMM."""
    N, Cin, H, W = x.shape
    Cout = w.shape[0]
    Hout = (H + 2 - 3) // stride + 1
    Wout = (W + 2 - 3) // stride + 1

    # im2col in bf16 (halves the duplicated-patch HBM traffic).
    # TODO(synk): fuse patch extraction into the kernel (halo DMA + shifted views)
    # to avoid materializing the 9x-duplicated patch tensor in HBM entirely.
    xp = jnp.pad(x, ((0, 0), (0, 0), (1, 1), (1, 1)))
    cols = []
    for ki in range(3):
        for kj in range(3):
            cols.append(
                xp[:, :,
                   ki:ki + stride * (Hout - 1) + 1:stride,
                   kj:kj + stride * (Wout - 1) + 1:stride])
    # (N, Cin, 9, Hout, Wout) -> (N, Cin*9, Hout*Wout); K order matches OIHW flatten.
    patches = jnp.stack(cols, axis=2).reshape(N, Cin * 9, Hout * Wout)
    patches = patches.astype(jnp.bfloat16)

    w2d = w.reshape(Cout, Cin * 9).astype(jnp.bfloat16)
    b2d = b.reshape(Cout, 1).astype(jnp.float32)
    out = _conv_gemm(patches, w2d, b2d, apply_relu, out_dtype)
    return out.reshape(N, Cout, Hout, Wout)


def _conv1x1(x, w, b, apply_relu, out_dtype):
    N, Cin, H, W = x.shape
    Cout = w.shape[0]
    patches = x.reshape(N, Cin, H * W).astype(jnp.bfloat16)
    w2d = w.reshape(Cout, Cin).astype(jnp.bfloat16)
    b2d = b.reshape(Cout, 1).astype(jnp.float32)
    out = _conv_gemm(patches, w2d, b2d, apply_relu, out_dtype)
    return out.reshape(N, Cout, H, W)


# ----------------------------------------------------------------------------
# Bilinear upsample (align_corners=True) as a Pallas kernel
# ----------------------------------------------------------------------------
def _interp_matrix(out_size, in_size):
    """f32 1-D interpolation matrix for bilinear with align_corners=True."""
    out_idx = jnp.arange(out_size, dtype=jnp.float32)
    if out_size > 1:
        src = out_idx * (float(in_size - 1) / float(out_size - 1))
    else:
        src = jnp.zeros((out_size,), jnp.float32)
    i0 = jnp.clip(jnp.floor(src).astype(jnp.int32), 0, in_size - 1)
    i1 = jnp.clip(i0 + 1, 0, in_size - 1)
    frac = src - i0.astype(jnp.float32)
    rows = jnp.arange(out_size)
    m = jnp.zeros((out_size, in_size), jnp.float32)
    m = m.at[rows, i0].add(1.0 - frac)
    m = m.at[rows, i1].add(frac)
    return m


def _upsample_kernel(r_ref, ct_ref, x_ref, o_ref, *, num_ch):
    # r_ref:  (Hout, Hin) f32 resident row-interp matrix
    # ct_ref: (Win, Wout) f32 resident (transposed) col-interp matrix
    # x_ref:  (C, Hin, Win) f32 logits for one batch element
    # o_ref:  (C, Hout, Wout) f32
    r = r_ref[...]
    ct = ct_ref[...]
    for c in range(num_ch):  # static unroll; C = num_classes is tiny
        xc = x_ref[c].astype(jnp.float32)
        yc = jnp.dot(xc, ct, preferred_element_type=jnp.float32)       # (Hin, Wout)
        o_ref[c] = jnp.dot(r, yc, preferred_element_type=jnp.float32)  # (Hout, Wout)


def _bilinear_upsample(x, Hout, Wout):
    N, C, Hin, Win = x.shape
    R = _interp_matrix(Hout, Hin)        # (Hout, Hin) f32
    CT = _interp_matrix(Wout, Win).T     # (Win, Wout) f32
    return pl.pallas_call(
        functools.partial(_upsample_kernel, num_ch=C),
        out_shape=jax.ShapeDtypeStruct((N, C, Hout, Wout), jnp.float32),
        grid_spec=pltpu.PrefetchScalarGridSpec(
            num_scalar_prefetch=0,
            grid=(N,),
            in_specs=[
                pl.BlockSpec((Hout, Hin), lambda n: (0, 0)),             # resident R
                pl.BlockSpec((Win, Wout), lambda n: (0, 0)),             # resident C^T
                pl.BlockSpec((None, C, Hin, Win), lambda n: (n, 0, 0, 0)),
            ],
            out_specs=pl.BlockSpec((None, C, Hout, Wout), lambda n: (n, 0, 0, 0)),
        ),
        compiler_params=pltpu.CompilerParams(
            dimension_semantics=("parallel",),
        ),
    )(R, CT, x)


# ----------------------------------------------------------------------------
# ModelWrapper.forward
# ----------------------------------------------------------------------------
def model_forward(params, x):
    """x: (N, 3, H, W) f32 NCHW -> (N, num_classes, H, W) f32 NCHW."""
    _, _, H, W = x.shape
    # backbone
    h = _conv3x3(x, params["w1"], params["b1"], stride=2, apply_relu=True,
                 out_dtype=jnp.bfloat16)
    h = _conv3x3(h, params["w2"], params["b2"], stride=2, apply_relu=True,
                 out_dtype=jnp.bfloat16)                     # features['out']
    # classifier
    h = _conv3x3(h, params["w3"], params["b3"], stride=1, apply_relu=True,
                 out_dtype=jnp.bfloat16)
    logits = _conv1x1(h, params["w4"], params["b4"], apply_relu=False,
                      out_dtype=jnp.float32)
    # F.interpolate(..., size=input_shape, mode='bilinear', align_corners=True)
    return _bilinear_upsample(logits, H, W)


# ----------------------------------------------------------------------------
# Pure-JAX reference (mirrors the bf16-operand / f32-accumulate arithmetic)
# ----------------------------------------------------------------------------
def _ref_conv(x, w, b, stride, pad, apply_relu, out_dtype):
    y = jax.lax.conv_general_dilated(
        x.astype(jnp.bfloat16), w.astype(jnp.bfloat16),
        window_strides=(stride, stride),
        padding=((pad, pad), (pad, pad)),
        dimension_numbers=("NCHW", "OIHW", "NCHW"),
        preferred_element_type=jnp.float32,
    )
    y = y + b.reshape(1, -1, 1, 1).astype(jnp.float32)
    if apply_relu:
        y = jnp.maximum(y, 0.0)
    return y.astype(out_dtype)


def reference_forward(params, x):
    H, W = x.shape[-2:]
    h = _ref_conv(x, params["w1"], params["b1"], 2, 1, True, jnp.bfloat16)
    h = _ref_conv(h, params["w2"], params["b2"], 2, 1, True, jnp.bfloat16)
    h = _ref_conv(h, params["w3"], params["b3"], 1, 1, True, jnp.bfloat16)
    logits = _ref_conv(h, params["w4"], params["b4"], 1, 0, False, jnp.float32)
    R = _interp_matrix(H, logits.shape[2])
    Cm = _interp_matrix(W, logits.shape[3])
    return jnp.einsum("oh,nchw,pw->ncop", R, logits, Cm)


# ----------------------------------------------------------------------------
if __name__ == "__main__":
    key = jax.random.PRNGKey(0)
    N, Cin, H, W = 2, 3, 16, 16
    num_classes = 5

    ks = jax.random.split(key, 9)
    x = jax.random.normal(ks[0], (N, Cin, H, W), jnp.float32)
    params = {
        "w1": jax.random.normal(ks[1], (8, 3, 3, 3), jnp.float32) * 0.2,
        "b1": jax.random.normal(ks[2], (8,), jnp.float32) * 0.1,
        "w2": jax.random.normal(ks[3], (16, 8, 3, 3), jnp.float32) * 0.15,
        "b2": jax.random.normal(ks[4], (16,), jnp.float32) * 0.1,
        "w3": jax.random.normal(ks[5], (8, 16, 3, 3), jnp.float32) * 0.1,
        "b3": jax.random.normal(ks[6], (8,), jnp.float32) * 0.1,
        "w4": jax.random.normal(ks[7], (num_classes, 8, 1, 1), jnp.float32) * 0.2,
        "b4": jax.random.normal(ks[8], (num_classes,), jnp.float32) * 0.1,
    }

    out = jax.jit(model_forward)(params, x)
    out = jax.block_until_ready(out)

    ref = jax.block_until_ready(reference_forward(params, x))
    assert out.shape == (N, num_classes, H, W), out.shape
    max_err = float(jnp.max(jnp.abs(out - ref)))
    assert max_err < 5e-2, f"max abs error vs reference: {max_err}"

    print("KERNEL_OK")
</pallas_src>

<mosaic_0001>
module attributes {stable_mosaic.version = 11 : i64} {
  func.func private @main(%arg0: i32) attributes {dimension_semantics = [#tpu.dimension_semantics<core_parallel>], iteration_bounds = array<i64: 2>, tpu.core_type = #tpu.core_type<sc_scalar_subcore>, window_params = []} {
    return
  }
}

module attributes {stable_mosaic.version = 11 : i64} {
  func.func private @main(%arg0: i32) attributes {dimension_semantics = [#tpu.dimension_semantics<core_parallel>], iteration_bounds = array<i64: 2>, tpu.core_type = #tpu.core_type<sc_scalar_subcore>, window_params = []} {
    return
  }
}

module attributes {stable_mosaic.version = 11 : i64} {
  func.func @_conv_gemm_kernel(%arg0: i32, %arg1: i32, %arg2: memref<8x27xbf16, #tpu.memory_space<vmem>>, %arg3: memref<8x1xf32, #tpu.memory_space<vmem>>, %arg4: memref<1x27x128xbf16, #tpu.memory_space<vmem>>, %arg5: memref<1x8x128xbf16, #tpu.memory_space<vmem>>) attributes {dimension_semantics = [#tpu.dimension_semantics<parallel>, #tpu.dimension_semantics<parallel>], iteration_bounds = array<i64: 2, 1>, scalar_prefetch = 0 : i64, scratch_operands = 0 : i64, tpu.core_type = #tpu.core_type<tc>, window_params = [{pipeline_mode = #tpu.pipeline_mode<synchronous>, transform_indices = @transform_0, window_bounds = array<i64: 8, 27>}, {pipeline_mode = #tpu.pipeline_mode<synchronous>, transform_indices = @transform_1, window_bounds = array<i64: 8, 1>}, {transform_indices = @transform_2, window_bounds = array<i64: 1, 27, 128>}, {transform_indices = @transform_3, window_bounds = array<i64: 1, 8, 128>}]} {
    %c0 = arith.constant 0 : index
    %c0_0 = arith.constant 0 : index
    %0 = vector.load %arg2[%c0, %c0_0] : memref<8x27xbf16, #tpu.memory_space<vmem>>, vector<8x27xbf16>
    %c0_1 = arith.constant 0 : index
    %c0_2 = arith.constant 0 : index
    %c0_3 = arith.constant 0 : index
    %1 = vector.load %arg4[%c0_1, %c0_2, %c0_3] : memref<1x27x128xbf16, #tpu.memory_space<vmem>>, vector<1x27x128xbf16>
    %2 = vector.shape_cast %1 : vector<1x27x128xbf16> to vector<27x128xbf16>
    %cst = arith.constant dense<0.000000e+00> : vector<8x128xf32>
    %3 = tpu.matmul %0, %2, %cst {dimension_numbers = #tpu.dot_dimension_numbers<[1], [0], [0], [1], [0, 0, 1, 1], [], []>} : vector<8x27xbf16>, vector<27x128xbf16>, vector<8x128xf32> -> vector<8x128xf32>
    %c0_4 = arith.constant 0 : index
    %c0_5 = arith.constant 0 : index
    %4 = vector.load %arg3[%c0_4, %c0_5] : memref<8x1xf32, #tpu.memory_space<vmem>>, vector<8x1xf32>
    %5 = vector.broadcast %4 : vector<8x1xf32> to vector<8x128xf32>
    %6 = arith.addf %3, %5 : vector<8x128xf32>
    %cst_6 = arith.constant 0.000000e+00 : f32
    %7 = vector.broadcast %cst_6 : f32 to vector<8x128xf32>
    %8 = arith.maximumf %6, %7 : vector<8x128xf32>
    %9 = arith.truncf %8 : vector<8x128xf32> to vector<8x128xbf16>
    %c0_7 = arith.constant 0 : index
    %c0_8 = arith.constant 0 : index
    %c0_9 = arith.constant 0 : index
    %10 = vector.load %arg5[%c0_7, %c0_8, %c0_9] : memref<1x8x128xbf16, #tpu.memory_space<vmem>>, vector<1x8x128xbf16>
    %11 = vector.shape_cast %10 : vector<1x8x128xbf16> to vector<8x128xbf16>
    %12 = vector.shape_cast %9 : vector<8x128xbf16> to vector<1x8x128xbf16>
    tpu.vector_store %arg5[%c0_7, %c0_8, %c0_9], %12 {strides = array<i32>} : memref<1x8x128xbf16, #tpu.memory_space<vmem>>, vector<1x8x128xbf16>,
    return
  }
  func.func @transform_0(%arg0: i32, %arg1: i32) -> (i32, i32) {
    %c0_i32 = arith.constant 0 : i32
    %c0_i32_0 = arith.constant 0 : i32
    %c0_i32_1 = arith.constant 0 : i32
    return %c0_i32, %c0_i32_0 : i32, i32
  }
  func.func @transform_1(%arg0: i32, %arg1: i32) -> (i32, i32) {
    %c0_i32 = arith.constant 0 : i32
    %c0_i32_0 = arith.constant 0 : i32
    %c0_i32_1 = arith.constant 0 : i32
    return %c0_i32, %c0_i32_0 : i32, i32
  }
  func.func @transform_2(%arg0: i32, %arg1: i32) -> (i32, i32, i32) {
    %c0_i32 = arith.constant 0 : i32
    %c0_i32_0 = arith.constant 0 : i32
    return %arg0, %c0_i32, %arg1 : i32, i32, i32
  }
  func.func @transform_3(%arg0: i32, %arg1: i32) -> (i32, i32, i32) {
    %c0_i32 = arith.constant 0 : i32
    %c0_i32_0 = arith.constant 0 : i32
    return %arg0, %c0_i32, %arg1 : i32, i32, i32
  }
}

module attributes {stable_mosaic.version = 11 : i64} {
  func.func @_conv_gemm_kernel(%arg0: i32, %arg1: i32, %arg2: memref<16x72xbf16, #tpu.memory_space<vmem>>, %arg3: memref<16x1xf32, #tpu.memory_space<vmem>>, %arg4: memref<1x72x128xbf16, #tpu.memory_space<vmem>>, %arg5: memref<1x16x128xbf16, #tpu.memory_space<vmem>>) attributes {dimension_semantics = [#tpu.dimension_semantics<parallel>, #tpu.dimension_semantics<parallel>], iteration_bounds = array<i64: 2, 1>, scalar_prefetch = 0 : i64, scratch_operands = 0 : i64, tpu.core_type = #tpu.core_type<tc>, window_params = [{pipeline_mode = #tpu.pipeline_mode<synchronous>, transform_indices = @transform_0, window_bounds = array<i64: 16, 72>}, {pipeline_mode = #tpu.pipeline_mode<synchronous>, transform_indices = @transform_1, window_bounds = array<i64: 16, 1>}, {transform_indices = @transform_2, window_bounds = array<i64: 1, 72, 128>}, {transform_indices = @transform_3, window_bounds = array<i64: 1, 16, 128>}]} {
    %c0 = arith.constant 0 : index
    %c0_0 = arith.constant 0 : index
    %0 = vector.load %arg2[%c0, %c0_0] : memref<16x72xbf16, #tpu.memory_space<vmem>>, vector<16x72xbf16>
    %c0_1 = arith.constant 0 : index
    %c0_2 = arith.constant 0 : index
    %c0_3 = arith.constant 0 : index
    %1 = vector.load %arg4[%c0_1, %c0_2, %c0_3] : memref<1x72x128xbf16, #tpu.memory_space<vmem>>, vector<1x72x128xbf16>
    %2 = vector.shape_cast %1 : vector<1x72x128xbf16> to vector<72x128xbf16>
    %cst = arith.constant dense<0.000000e+00> : vector<16x128xf32>
    %3 = tpu.matmul %0, %2, %cst {dimension_numbers = #tpu.dot_dimension_numbers<[1], [0], [0], [1], [0, 0, 1, 1], [], []>} : vector<16x72xbf16>, vector<72x128xbf16>, vector<16x128xf32> -> vector<16x128xf32>
    %c0_4 = arith.constant 0 : index
    %c0_5 = arith.constant 0 : index
    %4 = vector.load %arg3[%c0_4, %c0_5] : memref<16x1xf32, #tpu.memory_space<vmem>>, vector<16x1xf32>
    %5 = vector.broadcast %4 : vector<16x1xf32> to vector<16x128xf32>
    %6 = arith.addf %3, %5 : vector<16x128xf32>
    %cst_6 = arith.constant 0.000000e+00 : f32
    %7 = vector.broadcast %cst_6 : f32 to vector<16x128xf32>
    %8 = arith.maximumf %6, %7 : vector<16x128xf32>
    %9 = arith.truncf %8 : vector<16x128xf32> to vector<16x128xbf16>
    %c0_7 = arith.constant 0 : index
    %c0_8 = arith.constant 0 : index
    %c0_9 = arith.constant 0 : index
    %10 = vector.load %arg5[%c0_7, %c0_8, %c0_9] : memref<1x16x128xbf16, #tpu.memory_space<vmem>>, vector<1x16x128xbf16>
    %11 = vector.shape_cast %10 : vector<1x16x128xbf16> to vector<16x128xbf16>
    %12 = vector.shape_cast %9 : vector<16x128xbf16> to vector<1x16x128xbf16>
    tpu.vector_store %arg5[%c0_7, %c0_8, %c0_9], %12 {strides = array<i32>} : memref<1x16x128xbf16, #tpu.memory_space<vmem>>, vector<1x16x128xbf16>,
    return
  }
  func.func @transform_0(%arg0: i32, %arg1: i32) -> (i32, i32) {
    %c0_i32 = arith.constant 0 : i32
    %c0_i32_0 = arith.constant 0 : i32
    %c0_i32_1 = arith.constant 0 : i32
    return %c0_i32, %c0_i32_0 : i32, i32
  }
  func.func @transform_1(%arg0: i32, %arg1: i32) -> (i32, i32) {
    %c0_i32 = arith.constant 0 : i32
    %c0_i32_0 = arith.constant 0 : i32
    %c0_i32_1 = arith.constant 0 : i32
    return %c0_i32, %c0_i32_0 : i32, i32
  }
  func.func @transform_2(%arg0: i32, %arg1: i32) -> (i32, i32, i32) {
    %c0_i32 = arith.constant 0 : i32
    %c0_i32_0 = arith.constant 0 : i32
    return %arg0, %c0_i32, %arg1 : i32, i32, i32
  }
  func.func @transform_3(%arg0: i32, %arg1: i32) -> (i32, i32, i32) {
    %c0_i32 = arith.constant 0 : i32
    %c0_i32_0 = arith.constant 0 : i32
    return %arg0, %c0_i32, %arg1 : i32, i32, i32
  }
}

module attributes {stable_mosaic.version = 11 : i64} {
  func.func @_conv_gemm_kernel(%arg0: i32, %arg1: i32, %arg2: memref<8x144xbf16, #tpu.memory_space<vmem>>, %arg3: memref<8x1xf32, #tpu.memory_space<vmem>>, %arg4: memref<1x144x128xbf16, #tpu.memory_space<vmem>>, %arg5: memref<1x8x128xbf16, #tpu.memory_space<vmem>>) attributes {dimension_semantics = [#tpu.dimension_semantics<parallel>, #tpu.dimension_semantics<parallel>], iteration_bounds = array<i64: 2, 1>, scalar_prefetch = 0 : i64, scratch_operands = 0 : i64, tpu.core_type = #tpu.core_type<tc>, window_params = [{pipeline_mode = #tpu.pipeline_mode<synchronous>, transform_indices = @transform_0, window_bounds = array<i64: 8, 144>}, {pipeline_mode = #tpu.pipeline_mode<synchronous>, transform_indices = @transform_1, window_bounds = array<i64: 8, 1>}, {transform_indices = @transform_2, window_bounds = array<i64: 1, 144, 128>}, {transform_indices = @transform_3, window_bounds = array<i64: 1, 8, 128>}]} {
    %c0 = arith.constant 0 : index
    %c0_0 = arith.constant 0 : index
    %0 = vector.load %arg2[%c0, %c0_0] : memref<8x144xbf16, #tpu.memory_space<vmem>>, vector<8x144xbf16>
    %c0_1 = arith.constant 0 : index
    %c0_2 = arith.constant 0 : index
    %c0_3 = arith.constant 0 : index
    %1 = vector.load %arg4[%c0_1, %c0_2, %c0_3] : memref<1x144x128xbf16, #tpu.memory_space<vmem>>, vector<1x144x128xbf16>
    %2 = vector.shape_cast %1 : vector<1x144x128xbf16> to vector<144x128xbf16>
    %cst = arith.constant dense<0.000000e+00> : vector<8x128xf32>
    %3 = tpu.matmul %0, %2, %cst {dimension_numbers = #tpu.dot_dimension_numbers<[1], [0], [0], [1], [0, 0, 1, 1], [], []>} : vector<8x144xbf16>, vector<144x128xbf16>, vector<8x128xf32> -> vector<8x128xf32>
    %c0_4 = arith.constant 0 : index
    %c0_5 = arith.constant 0 : index
    %4 = vector.load %arg3[%c0_4, %c0_5] : memref<8x1xf32, #tpu.memory_space<vmem>>, vector<8x1xf32>
    %5 = vector.broadcast %4 : vector<8x1xf32> to vector<8x128xf32>
    %6 = arith.addf %3, %5 : vector<8x128xf32>
    %cst_6 = arith.constant 0.000000e+00 : f32
    %7 = vector.broadcast %cst_6 : f32 to vector<8x128xf32>
    %8 = arith.maximumf %6, %7 : vector<8x128xf32>
    %9 = arith.truncf %8 : vector<8x128xf32> to vector<8x128xbf16>
    %c0_7 = arith.constant 0 : index
    %c0_8 = arith.constant 0 : index
    %c0_9 = arith.constant 0 : index
    %10 = vector.load %arg5[%c0_7, %c0_8, %c0_9] : memref<1x8x128xbf16, #tpu.memory_space<vmem>>, vector<1x8x128xbf16>
    %11 = vector.shape_cast %10 : vector<1x8x128xbf16> to vector<8x128xbf16>
    %12 = vector.shape_cast %9 : vector<8x128xbf16> to vector<1x8x128xbf16>
    tpu.vector_store %arg5[%c0_7, %c0_8, %c0_9], %12 {strides = array<i32>} : memref<1x8x128xbf16, #tpu.memory_space<vmem>>, vector<1x8x128xbf16>,
    return
  }
  func.func @transform_0(%arg0: i32, %arg1: i32) -> (i32, i32) {
    %c0_i32 = arith.constant 0 : i32
    %c0_i32_0 = arith.constant 0 : i32
    %c0_i32_1 = arith.constant 0 : i32
    return %c0_i32, %c0_i32_0 : i32, i32
  }
  func.func @transform_1(%arg0: i32, %arg1: i32) -> (i32, i32) {
    %c0_i32 = arith.constant 0 : i32
    %c0_i32_0 = arith.constant 0 : i32
    %c0_i32_1 = arith.constant 0 : i32
    return %c0_i32, %c0_i32_0 : i32, i32
  }
  func.func @transform_2(%arg0: i32, %arg1: i32) -> (i32, i32, i32) {
    %c0_i32 = arith.constant 0 : i32
    %c0_i32_0 = arith.constant 0 : i32
    return %arg0, %c0_i32, %arg1 : i32, i32, i32
  }
  func.func @transform_3(%arg0: i32, %arg1: i32) -> (i32, i32, i32) {
    %c0_i32 = arith.constant 0 : i32
    %c0_i32_0 = arith.constant 0 : i32
    return %arg0, %c0_i32, %arg1 : i32, i32, i32
  }
}

module attributes {stable_mosaic.version = 11 : i64} {
  func.func @_conv_gemm_kernel(%arg0: i32, %arg1: i32, %arg2: memref<5x8xbf16, #tpu.memory_space<vmem>>, %arg3: memref<5x1xf32, #tpu.memory_space<vmem>>, %arg4: memref<1x8x128xbf16, #tpu.memory_space<vmem>>, %arg5: memref<1x5x128xf32, #tpu.memory_space<vmem>>) attributes {dimension_semantics = [#tpu.dimension_semantics<parallel>, #tpu.dimension_semantics<parallel>], iteration_bounds = array<i64: 2, 1>, scalar_prefetch = 0 : i64, scratch_operands = 0 : i64, tpu.core_type = #tpu.core_type<tc>, window_params = [{pipeline_mode = #tpu.pipeline_mode<synchronous>, transform_indices = @transform_0, window_bounds = array<i64: 5, 8>}, {pipeline_mode = #tpu.pipeline_mode<synchronous>, transform_indices = @transform_1, window_bounds = array<i64: 5, 1>}, {transform_indices = @transform_2, window_bounds = array<i64: 1, 8, 128>}, {transform_indices = @transform_3, window_bounds = array<i64: 1, 5, 128>}]} {
    %c0 = arith.constant 0 : index
    %c0_0 = arith.constant 0 : index
    %0 = vector.load %arg2[%c0, %c0_0] : memref<5x8xbf16, #tpu.memory_space<vmem>>, vector<5x8xbf16>
    %c0_1 = arith.constant 0 : index
    %c0_2 = arith.constant 0 : index
    %c0_3 = arith.constant 0 : index
    %1 = vector.load %arg4[%c0_1, %c0_2, %c0_3] : memref<1x8x128xbf16, #tpu.memory_space<vmem>>, vector<1x8x128xbf16>
    %2 = vector.shape_cast %1 : vector<1x8x128xbf16> to vector<8x128xbf16>
    %cst = arith.constant dense<0.000000e+00> : vector<5x128xf32>
    %3 = tpu.matmul %0, %2, %cst {dimension_numbers = #tpu.dot_dimension_numbers<[1], [0], [0], [1], [0, 0, 1, 1], [], []>} : vector<5x8xbf16>, vector<8x128xbf16>, vector<5x128xf32> -> vector<5x128xf32>
    %c0_4 = arith.constant 0 : index
    %c0_5 = arith.constant 0 : index
    %4 = vector.load %arg3[%c0_4, %c0_5] : memref<5x1xf32, #tpu.memory_space<vmem>>, vector<5x1xf32>
    %5 = vector.broadcast %4 : vector<5x1xf32> to vector<5x128xf32>
    %6 = arith.addf %3, %5 : vector<5x128xf32>
    %c0_6 = arith.constant 0 : index
    %c0_7 = arith.constant 0 : index
    %c0_8 = arith.constant 0 : index
    %7 = vector.load %arg5[%c0_6, %c0_7, %c0_8] : memref<1x5x128xf32, #tpu.memory_space<vmem>>, vector<1x5x128xf32>
    %8 = vector.shape_cast %7 : vector<1x5x128xf32> to vector<5x128xf32>
    %9 = vector.shape_cast %6 : vector<5x128xf32> to vector<1x5x128xf32>
    tpu.vector_store %arg5[%c0_6, %c0_7, %c0_8], %9 {strides = array<i32>} : memref<1x5x128xf32, #tpu.memory_space<vmem>>, vector<1x5x128xf32>,
    return
  }
  func.func @transform_0(%arg0: i32, %arg1: i32) -> (i32, i32) {
    %c0_i32 = arith.constant 0 : i32
    %c0_i32_0 = arith.constant 0 : i32
    %c0_i32_1 = arith.constant 0 : i32
    return %c0_i32, %c0_i32_0 : i32, i32
  }
  func.func @transform_1(%arg0: i32, %arg1: i32) -> (i32, i32) {
    %c0_i32 = arith.constant 0 : i32
    %c0_i32_0 = arith.constant 0 : i32
    %c0_i32_1 = arith.constant 0 : i32
    return %c0_i32, %c0_i32_0 : i32, i32
  }
  func.func @transform_2(%arg0: i32, %arg1: i32) -> (i32, i32, i32) {
    %c0_i32 = arith.constant 0 : i32
    %c0_i32_0 = arith.constant 0 : i32
    return %arg0, %c0_i32, %arg1 : i32, i32, i32
  }
  func.func @transform_3(%arg0: i32, %arg1: i32) -> (i32, i32, i32) {
    %c0_i32 = arith.constant 0 : i32
    %c0_i32_0 = arith.constant 0 : i32
    return %arg0, %c0_i32, %arg1 : i32, i32, i32
  }
}

module attributes {stable_mosaic.version = 11 : i64} {
  func.func @_upsample_kernel(%arg0: i32, %arg1: memref<16x4xf32, #tpu.memory_space<vmem>>, %arg2: memref<4x16xf32, #tpu.memory_space<vmem>>, %arg3: memref<1x5x4x4xf32, #tpu.memory_space<vmem>>, %arg4: memref<1x5x16x16xf32, #tpu.memory_space<vmem>>) attributes {dimension_semantics = [#tpu.dimension_semantics<parallel>], iteration_bounds = array<i64: 2>, scalar_prefetch = 0 : i64, scratch_operands = 0 : i64, tpu.core_type = #tpu.core_type<tc>, window_params = [{pipeline_mode = #tpu.pipeline_mode<synchronous>, transform_indices = @transform_0, window_bounds = array<i64: 16, 4>}, {pipeline_mode = #tpu.pipeline_mode<synchronous>, transform_indices = @transform_1, window_bounds = array<i64: 4, 16>}, {transform_indices = @transform_2, window_bounds = array<i64: 1, 5, 4, 4>}, {transform_indices = @transform_3, window_bounds = array<i64: 1, 5, 16, 16>}]} {
    %c0 = arith.constant 0 : index
    %c0_0 = arith.constant 0 : index
    %0 = vector.load %arg1[%c0, %c0_0] : memref<16x4xf32, #tpu.memory_space<vmem>>, vector<16x4xf32>
    %c0_1 = arith.constant 0 : index
    %c0_2 = arith.constant 0 : index
    %1 = vector.load %arg2[%c0_1, %c0_2] : memref<4x16xf32, #tpu.memory_space<vmem>>, vector<4x16xf32>
    %c0_3 = arith.constant 0 : index
    %c0_4 = arith.constant 0 : index
    %c0_5 = arith.constant 0 : index
    %c0_6 = arith.constant 0 : index
    %2 = vector.load %arg3[%c0_3, %c0_4, %c0_5, %c0_6] : memref<1x5x4x4xf32, #tpu.memory_space<vmem>>, vector<1x1x4x4xf32>
    %3 = vector.shape_cast %2 : vector<1x1x4x4xf32> to vector<4x4xf32>
    %cst = arith.constant dense<0.000000e+00> : vector<4x16xf32>
    %4 = tpu.matmul %3, %1, %cst {dimension_numbers = #tpu.dot_dimension_numbers<[1], [0], [0], [1], [0, 0, 1, 1], [], []>} : vector<4x4xf32>, vector<4x16xf32>, vector<4x16xf32> -> vector<4x16xf32>
    %cst_7 = arith.constant dense<0.000000e+00> : vector<16x16xf32>
    %5 = tpu.matmul %0, %4, %cst_7 {dimension_numbers = #tpu.dot_dimension_numbers<[1], [0], [0], [1], [0, 0, 1, 1], [], []>} : vector<16x4xf32>, vector<4x16xf32>, vector<16x16xf32> -> vector<16x16xf32>
    %c0_8 = arith.constant 0 : index
    %c0_9 = arith.constant 0 : index
    %c0_10 = arith.constant 0 : index
    %c0_11 = arith.constant 0 : index
    %6 = vector.load %arg4[%c0_8, %c0_9, %c0_10, %c0_11] : memref<1x5x16x16xf32, #tpu.memory_space<vmem>>, vector<1x1x16x16xf32>
    %7 = vector.shape_cast %6 : vector<1x1x16x16xf32> to vector<16x16xf32>
    %8 = vector.shape_cast %5 : vector<16x16xf32> to vector<1x1x16x16xf32>
    tpu.vector_store %arg4[%c0_8, %c0_9, %c0_10, %c0_11], %8 {strides = array<i32>} : memref<1x5x16x16xf32, #tpu.memory_space<vmem>>, vector<1x1x16x16xf32>,
    %c0_12 = arith.constant 0 : index
    %c1 = arith.constant 1 : index
    %c0_13 = arith.constant 0 : index
    %c0_14 = arith.constant 0 : index
    %9 = vector.load %arg3[%c0_12, %c1, %c0_13, %c0_14] : memref<1x5x4x4xf32, #tpu.memory_space<vmem>>, vector<1x1x4x4xf32>
    %10 = vector.shape_cast %9 : vector<1x1x4x4xf32> to vector<4x4xf32>
    %cst_15 = arith.constant dense<0.000000e+00> : vector<4x16xf32>
    %11 = tpu.matmul %10, %1, %cst_15 {dimension_numbers = #tpu.dot_dimension_numbers<[1], [0], [0], [1], [0, 0, 1, 1], [], []>} : vector<4x4xf32>, vector<4x16xf32>, vector<4x16xf32> -> vector<4x16xf32>
    %cst_16 = arith.constant dense<0.000000e+00> : vector<16x16xf32>
    %12 = tpu.matmul %0, %11, %cst_16 {dimension_numbers = #tpu.dot_dimension_numbers<[1], [0], [0], [1], [0, 0, 1, 1], [], []>} : vector<16x4xf32>, vector<4x16xf32>, vector<16x16xf32> -> vector<16x16xf32>
    %c0_17 = arith.constant 0 : index
    %c1_18 = arith.constant 1 : index
    %c0_19 = arith.constant 0 : index
    %c0_20 = arith.constant 0 : index
    %13 = vector.load %arg4[%c0_17, %c1_18, %c0_19, %c0_20] : memref<1x5x16x16xf32, #tpu.memory_space<vmem>>, vector<1x1x16x16xf32>
    %14 = vector.shape_cast %13 : vector<1x1x16x16xf32> to vector<16x16xf32>
    %15 = vector.shape_cast %12 : vector<16x16xf32> to vector<1x1x16x16xf32>
    tpu.vector_store %arg4[%c0_17, %c1_18, %c0_19, %c0_20], %15 {strides = array<i32>} : memref<1x5x16x16xf32, #tpu.memory_space<vmem>>, vector<1x1x16x16xf32>,
    %c0_21 = arith.constant 0 : index
    %c2 = arith.constant 2 : index
    %c0_22 = arith.constant 0 : index
    %c0_23 = arith.constant 0 : index
    %16 = vector.load %arg3[%c0_21, %c2, %c0_22, %c0_23] : memref<1x5x4x4xf32, #tpu.memory_space<vmem>>, vector<1x1x4x4xf32>
    %17 = vector.shape_cast %16 : vector<1x1x4x4xf32> to vector<4x4xf32>
    %cst_24 = arith.constant dense<0.000000e+00> : vector<4x16xf32>
    %18 = tpu.matmul %17, %1, %cst_24 {dimension_numbers = #tpu.dot_dimension_numbers<[1], [0], [0], [1], [0, 0, 1, 1], [], []>} : vector<4x4xf32>, vector<4x16xf32>, vector<4x16xf32> -> vector<4x16xf32>
    %cst_25 = arith.constant dense<0.000000e+00> : vector<16x16xf32>
    %19 = tpu.matmul %0, %18, %cst_25 {dimension_numbers = #tpu.dot_dimension_numbers<[1], [0], [0], [1], [0, 0, 1, 1], [], []>} : vector<16x4xf32>, vector<4x16xf32>, vector<16x16xf32> -> vector<16x16xf32>
    %c0_26 = arith.constant 0 : index
    %c2_27 = arith.constant 2 : index
    %c0_28 = arith.constant 0 : index
    %c0_29 = arith.constant 0 : index
    %20 = vector.load %arg4[%c0_26, %c2_27, %c0_28, %c0_29] : memref<1x5x16x16xf32, #tpu.memory_space<vmem>>, vector<1x1x16x16xf32>
    %21 = vector.shape_cast %20 : vector<1x1x16x16xf32> to vector<16x16xf32>
    %22 = vector.shape_cast %19 : vector<16x16xf32> to vector<1x1x16x16xf32>
    tpu.vector_store %arg4[%c0_26, %c2_27, %c0_28, %c0_29], %22 {strides = array<i32>} : memref<1x5x16x16xf32, #tpu.memory_space<vmem>>, vector<1x1x16x16xf32>,
    %c0_30 = arith.constant 0 : index
    %c3 = arith.constant 3 : index
    %c0_31 = arith.constant 0 : index
    %c0_32 = arith.constant 0 : index
    %23 = vector.load %arg3[%c0_30, %c3, %c0_31, %c0_32] : memref<1x5x4x4xf32, #tpu.memory_space<vmem>>, vector<1x1x4x4xf32>
    %24 = vector.shape_cast %23 : vector<1x1x4x4xf32> to vector<4x4xf32>
    %cst_33 = arith.constant dense<0.000000e+00> : vector<4x16xf32>
    %25 = tpu.matmul %24, %1, %cst_33 {dimension_numbers = #tpu.dot_dimension_numbers<[1], [0], [0], [1], [0, 0, 1, 1], [], []>} : vector<4x4xf32>, vector<4x16xf32>, vector<4x16xf32> -> vector<4x16xf32>
    %cst_34 = arith.constant dense<0.000000e+00> : vector<16x16xf32>
    %26 = tpu.matmul %0, %25, %cst_34 {dimension_numbers = #tpu.dot_dimension_numbers<[1], [0], [0], [1], [0, 0, 1, 1], [], []>} : vector<16x4xf32>, vector<4x16xf32>, vector<16x16xf32> -> vector<16x16xf32>
    %c0_35 = arith.constant 0 : index
    %c3_36 = arith.constant 3 : index
    %c0_37 = arith.constant 0 : index
    %c0_38 = arith.constant 0 : index
    %27 = vector.load %arg4[%c0_35, %c3_36, %c0_37, %c0_38] : memref<1x5x16x16xf32, #tpu.memory_space<vmem>>, vector<1x1x16x16xf32>
    %28 = vector.shape_cast %27 : vector<1x1x16x16xf32> to vector<16x16xf32>
    %29 = vector.shape_cast %26 : vector<16x16xf32> to vector<1x1x16x16xf32>
    tpu.vector_store %arg4[%c0_35, %c3_36, %c0_37, %c0_38], %29 {strides = array<i32>} : memref<1x5x16x16xf32, #tpu.memory_space<vmem>>, vector<1x1x16x16xf32>,
    %c0_39 = arith.constant 0 : index
    %c4 = arith.constant 4 : index
    %c0_40 = arith.constant 0 : index
    %c0_41 = arith.constant 0 : index
    %30 = vector.load %arg3[%c0_39, %c4, %c0_40, %c0_41] : memref<1x5x4x4xf32, #tpu.memory_space<vmem>>, vector<1x1x4x4xf32>
    %31 = vector.shape_cast %30 : vector<1x1x4x4xf32> to vector<4x4xf32>
    %cst_42 = arith.constant dense<0.000000e+00> : vector<4x16xf32>
    %32 = tpu.matmul %31, %1, %cst_42 {dimension_numbers = #tpu.dot_dimension_numbers<[1], [0], [0], [1], [0, 0, 1, 1], [], []>} : vector<4x4xf32>, vector<4x16xf32>, vector<4x16xf32> -> vector<4x16xf32>
    %cst_43 = arith.constant dense<0.000000e+00> : vector<16x16xf32>
    %33 = tpu.matmul %0, %32, %cst_43 {dimension_numbers = #tpu.dot_dimension_numbers<[1], [0], [0], [1], [0, 0, 1, 1], [], []>} : vector<16x4xf32>, vector<4x16xf32>, vector<16x16xf32> -> vector<16x16xf32>
    %c0_44 = arith.constant 0 : index
    %c4_45 = arith.constant 4 : index
    %c0_46 = arith.constant 0 : index
    %c0_47 = arith.constant 0 : index
    %34 = vector.load %arg4[%c0_44, %c4_45, %c0_46, %c0_47] : memref<1x5x16x16xf32, #tpu.memory_space<vmem>>, vector<1x1x16x16xf32>
    %35 = vector.shape_cast %34 : vector<1x1x16x16xf32> to vector<16x16xf32>
    %36 = vector.shape_cast %33 : vector<16x16xf32> to vector<1x1x16x16xf32>
    tpu.vector_store %arg4[%c0_44, %c4_45, %c0_46, %c0_47], %36 {strides = array<i32>} : memref<1x5x16x16xf32, #tpu.memory_space<vmem>>, vector<1x1x16x16xf32>,
    return
  }
  func.func @transform_0(%arg0: i32) -> (i32, i32) {
    %c0_i32 = arith.constant 0 : i32
    %c0_i32_0 = arith.constant 0 : i32
    %c0_i32_1 = arith.constant 0 : i32
    return %c0_i32, %c0_i32_0 : i32, i32
  }
  func.func @transform_1(%arg0: i32) -> (i32, i32) {
    %c0_i32 = arith.constant 0 : i32
    %c0_i32_0 = arith.constant 0 : i32
    %c0_i32_1 = arith.constant 0 : i32
    return %c0_i32, %c0_i32_0 : i32, i32
  }
  func.func @transform_2(%arg0: i32) -> (i32, i32, i32, i32) {
    %c0_i32 = arith.constant 0 : i32
    %c0_i32_0 = arith.constant 0 : i32
    %c0_i32_1 = arith.constant 0 : i32
    %c0_i32_2 = arith.constant 0 : i32
    return %arg0, %c0_i32, %c0_i32_0, %c0_i32_1 : i32, i32, i32, i32
  }
  func.func @transform_3(%arg0: i32) -> (i32, i32, i32, i32) {
    %c0_i32 = arith.constant 0 : i32
    %c0_i32_0 = arith.constant 0 : i32
    %c0_i32_1 = arith.constant 0 : i32
    %c0_i32_2 = arith.constant 0 : i32
    return %arg0, %c0_i32, %c0_i32_0, %c0_i32_1 : i32, i32, i32, i32
  }
}

</mosaic_0001>

<bundles_post_ra>
// kernel: model_forward.5
= control target key start
LH: loop header
LB: loop body
LE: loop exit
PB: predicated region body
PF: predicated region fallthrough
CT: control target
= control target key end

     0   :  { %s458_s12 = smov 0   ;;  %s460_s13 = smov 0   ;;  %s501_s0 = inlined_call_operand.vmem [shape: bf16[8,27], index: 0, kind: input, shape index: {}]   ;;  %s502_s1 = inlined_call_operand.vmem [shape: f32[8,1], index: 1, kind: input, shape index: {}]   ;;  %s503_s2 = inlined_call_operand.vmem [shape: bf16[2,27,128], index: 2, kind: input, shape index: {}]   ;;  %s504_s3 = inlined_call_operand.vmem [shape: bf16[2,8,128], index: 3, kind: output, shape index: {}]  }
   0x1   :  { %s462_s14 = smov 0  }
   0x2 LB: > { %s25_s15 = sadd.s32 1, %s428_s13  ;;  %p358_p0 = scmp.ge.s32.totalorder %s432_s14, 1  ;;  %s432_s14 = sphi %s462_s14, %s13_s14   ;;  %s428_s13 = sphi %s460_s13, %s506_s13   ;;  %s424_s12 = sphi %s458_s12, %s505_s12  }
   0x3   : > { %p27_p1 = scmp.ge.s32.totalorder %s25_s15, 2  ;;  %p156_p2 = scmp.lt.s32.totalorder %s432_s14, 3 }
   0x5   : > { %s508_s15 = smov (%p27_p1, %s25_s15), 0  ;;  %p157_p3 = pnand %p358_p0, %p156_p2 }
   0x6   : > { %p185_p4 = scmp.lt.s32.totalorder (!%p157_p3), %s424_s12, 1  ;;  %vm227_vm0 = vcmask (!%p157_p3), 1044480   ;;  %v206_v0 = vld [vmem:[%s502_s1] sm:$0xff] (!%p157_p3)  ;;  %v434_v1 = vmov (!%p157_p3), 0.0   ;;  %vm435_vm1 = vmmov (!%p157_p3), 0   ;;  %v436_v2 = vmov (!%p157_p3), 0  }
   0x7   : > { %160 = sbr.rel (%p157_p3) target bundleno = 244 (0xf4), region = 32  ;;  %371 = vmatprep.subr.bf16.mxu0 (!%p157_p3), %v434_v1  ;;  %375 = vmatprep.mubr.msk.bf16.mxu0 (!%p157_p3), %vm435_vm1, %v434_v1  ;;  %vm228_vm2 = vcmask (!%p157_p3), 1045504   ;;  %v437_v3 = vmov (!%p157_p3), 65535   ;;  %v201_v9 = vld [vmem:[%s501_s0] sm:$0xf] (!%p157_p3)  ;;  %vm223_vm3 = vcmask (!%p157_p3), 220160  }
   0x8   : > { %407 = vset.pattern.permute.xlu0 (!%p157_p3), %v436_v2  ;;  %v229_v4 = vsel (!%p157_p3), %vm227_vm0, 4294967295, %v437_v3 }
   0x9   : > { %209 = vperm.xlu0 (!%p157_p3), %407, %v206_v0   ;;  %v230_v6 = vsel (!%p157_p3), %vm228_vm2, %v229_v4, 0 }
   0xe   : > { %s510_s12 = smov (!%p185_p4, %s424_s12), 1 }
   0xf   : > { %s367_s18 = sshll.u32 %s510_s12, 4  ;;  %s361_s24 = sshll.u32 %s510_s12, 2 }
  0x10   : > { %s192_s21 = scalar_lea.vmem %s503_s2, %s367_s18  ;;  %s199_s27 = scalar_lea.vmem %s504_s3, %s361_s24 }
  0x11   : > { %v408_v5 = vld [vmem:[%s192_s21] sm:$0xff]   ;;  %v409_v7 = vld [vmem:[%s192_s21 + $0x8] sm:$0x3f]  }
  0x12   : > { %372 = vmatpush3.bf16.msra.mxu0 %v408_v5  ;;  %v232_v8 = vand.u32 %v409_v7, %v230_v6 }
  0x13   : > { %373 = vmatprep.subr.bf16.mxu0 %v434_v1 }
  0x16   : > { %374 = vmatpush3.bf16.msra.mxu0 %v232_v8 }
  0x19   : > { %376 = vmatmul.mubr.msk.bf16.vlgmr.msra.gmra.mrb[0].mxu0 %vm223_vm3, %v201_v9 }
  0x88   : > { %v210_v10 = vpop.permute.xlu0 %209 }
  0xec   : > { %v268_v11 = vpop.f32.mrb[0].mxu0 }
  0xed   : > { %v269_v12 = vadd.f32 %v268_v11, %v210_v10  ;;  %v377_v13 = vpop.f32.mrb[1].mxu0 }
  0xee   : > { %v271_v14 = vpop.f32.mrb[2].mxu0 }
  0xef   : > { %v274_v15 = vmax.f32 %v269_v12, 0.0  ;;  %v378_v16 = vpop.f32.mrb[3].mxu0 }
  0xf1   : > { %v275_v17 = vpack.c.bf16 %v274_v15, %v274_v15 }
  0xf3   : > { %276 = vst [vmem:[%s199_s27] sm:$0xf] %v275_v17 }
  0xf4 PF: > { %s13_s14 = sadd.s32 1, %s432_s14   ;;  %s505_s12 = smov %s428_s13 }
  0xf5   : > { %p10_p5 = scmp.ge.s32.totalorder %s13_s14, 4   ;;  %s506_s13 = smov %s508_s15 }
  0xf7   :  { %12 = sbr.rel (!%p10_p5) target bundleno = 2 (0x2), region = 62 }

// kernel: model_forward.6
= control target key start
LH: loop header
LB: loop body
LE: loop exit
PB: predicated region body
PF: predicated region fallthrough
CT: control target
= control target key end

     0   :  { %s531_s12 = smov 0   ;;  %s533_s13 = smov 0   ;;  %s577_s0 = inlined_call_operand.vmem [shape: bf16[16,72], index: 0, kind: input, shape index: {}]   ;;  %s578_s1 = inlined_call_operand.vmem [shape: f32[16,1], index: 1, kind: input, shape index: {}]   ;;  %s579_s2 = inlined_call_operand.vmem [shape: bf16[2,72,128], index: 2, kind: input, shape index: {}]   ;;  %s580_s3 = inlined_call_operand.vmem [shape: bf16[2,16,128], index: 3, kind: output, shape index: {}]  }
   0x1   :  { %s535_s14 = smov 0  }
   0x2 LB: > { %s25_s15 = sadd.s32 1, %s502_s13  ;;  %p406_p0 = scmp.ge.s32.totalorder %s506_s14, 1  ;;  %s506_s14 = sphi %s535_s14, %s13_s14   ;;  %s502_s13 = sphi %s533_s13, %s582_s13   ;;  %s498_s12 = sphi %s531_s12, %s581_s12  }
   0x3   : > { %p27_p1 = scmp.ge.s32.totalorder %s25_s15, 2  ;;  %p156_p2 = scmp.lt.s32.totalorder %s506_s14, 3 }
   0x5   : > { %s584_s15 = smov (%p27_p1, %s25_s15), 0  ;;  %p157_p3 = pnand %p406_p0, %p156_p2 }
   0x6   : > { %p186_p4 = scmp.lt.s32.totalorder (!%p157_p3), %s498_s12, 1  ;;  %v508_v0 = vmov (!%p157_p3), 0.0   ;;  %vm509_vm0 = vmmov (!%p157_p3), 0   ;;  %v214_v1 = vld [vmem:[%s578_s1] sm:$0xff] (!%p157_p3)  ;;  %v510_v2 = vmov (!%p157_p3), 0   ;;  %v215_v3 = vld [vmem:[%s578_s1 + $0x8] sm:$0xff] (!%p157_p3) }
   0x7   : > { %160 = sbr.rel (%p157_p3) target bundleno = 259 (0x103), region = 32  ;;  %435 = vmatprep.subr.bf16.mxu0 (!%p157_p3), %v508_v0  ;;  %445 = vmatprep.mubr.msk.bf16.mxu0 (!%p157_p3), %vm509_vm0, %v508_v0  ;;  %vm262_vm1 = vcmask (!%p157_p3), 1043456   ;;  %v483_v10 = vld [vmem:[%s577_s0] sm:$0xff] (!%p157_p3)   ;;  %vm258_vm2 = vcmask (!%p157_p3), 588800  }
   0x8   : > { %477 = vset.pattern.permute.xlu0 (!%p157_p3), %v510_v2 }
   0x9   : > { %218 = vperm.xlu0 (!%p157_p3), %477, %v214_v1  }
   0xd   : > { %223 = vperm.xlu0 (!%p157_p3), %477, %v215_v3  }
   0xe   : > { %s586_s12 = smov (!%p186_p4, %s498_s12), 1 }
   0xf   : > { %s449_s18 = smul.u32 36, %s586_s12  ;;  %s421_s26 = sshll.u32 %s586_s12, 3 }
  0x10   : > { %s201_s29 = scalar_lea.vmem %s580_s3, %s421_s26 }
  0x11   : > { %s193_s23 = scalar_lea.vmem %s579_s2, %s449_s18 }
  0x12   : > { %v478_v4 = vld [vmem:[%s193_s23] sm:$0xff]   ;;  %v479_v5 = vld [vmem:[%s193_s23 + $0x8] sm:$0xff]   ;;  %v480_v6 = vld [vmem:[%s193_s23 + $0x10] sm:$0xff]  }
  0x13   : > { %436 = vmatpush3.bf16.msra.mxu0 %v478_v4  ;;  %v481_v7 = vld [vmem:[%s193_s23 + $0x18] sm:$0xff]   ;;  %v482_v8 = vld [vmem:[%s193_s23 + $0x20] ss:$0 sps:$4 sm:$0xff]  }
  0x14   : > { %437 = vmatprep.subr.bf16.mxu0 %v508_v0  ;;  %v264_v9 = vsel %vm262_vm1, %v482_v8, 0 }
  0x17   : > { %438 = vmatpush3.bf16.msra.mxu0 %v479_v5 }
  0x18   : > { %439 = vmatprep.subr.bf16.mxu0 %v508_v0 }
  0x1b   : > { %440 = vmatpush3.bf16.msra.mxu0 %v480_v6 }
  0x1c   : > { %441 = vmatprep.subr.bf16.mxu0 %v508_v0 }
  0x1f   : > { %442 = vmatpush3.bf16.msra.mxu0 %v481_v7 }
  0x20   : > { %443 = vmatprep.subr.bf16.mxu0 %v508_v0 }
  0x23   : > { %444 = vmatpush3.bf16.msra.mxu0 %v264_v9 }
  0x26   : > { %446 = vmatmul.mubr.msk.bf16.vlgmr.msra.gmra.mrb[0].mxu0 %vm258_vm2, %v483_v10 }
  0x88   : > { %v219_v11 = vpop.permute.xlu0 %218 }
  0x8c   : > { %v224_v15 = vpop.permute.xlu0 %223 }
  0xf9   : > { %v300_v12 = vpop.f32.mrb[0].mxu0 }
  0xfa   : > { %v301_v13 = vadd.f32 %v300_v12, %v219_v11  ;;  %v447_v14 = vpop.f32.mrb[1].mxu0 }
  0xfb   : > { %v303_v16 = vpop.f32.mrb[2].mxu0 }
  0xfc   : > { %v304_v17 = vadd.f32 %v303_v16, %v224_v15  ;;  %v448_v18 = vpop.f32.mrb[3].mxu0  ;;  %v307_v19 = vmax.f32 %v301_v13, 0.0 }
  0xfe   : > { %v308_v20 = vmax.f32 %v304_v17, 0.0 }
 0x100   : > { %v427_v21 = vpack.c.bf16 %v308_v20, %v307_v19 }
 0x102   : > { %428 = vst [vmem:[%s201_s29] sm:$0xff] %v427_v21  }
 0x103 PF: > { %s13_s14 = sadd.s32 1, %s506_s14   ;;  %s581_s12 = smov %s502_s13 }
 0x104   : > { %p10_p5 = scmp.ge.s32.totalorder %s13_s14, 4   ;;  %s582_s13 = smov %s584_s15 }
 0x106   :  { %12 = sbr.rel (!%p10_p5) target bundleno = 2 (0x2), region = 62 }

// kernel: model_forward.7
= control target key start
LH: loop header
LB: loop body
LE: loop exit
PB: predicated region body
PF: predicated region fallthrough
CT: control target
= control target key end

     0   :  { %s514_s12 = smov 0   ;;  %s516_s13 = smov 0   ;;  %s557_s0 = inlined_call_operand.vmem [shape: bf16[8,144], index: 0, kind: input, shape index: {}]   ;;  %s558_s1 = inlined_call_operand.vmem [shape: f32[8,1], index: 1, kind: input, shape index: {}]   ;;  %s559_s2 = inlined_call_operand.vmem [shape: bf16[2,144,128], index: 2, kind: input, shape index: {}]   ;;  %s560_s3 = inlined_call_operand.vmem [shape: bf16[2,8,128], index: 3, kind: output, shape index: {}]  }
   0x1   :  { %s518_s14 = smov 0  }
   0x2 LB: > { %s25_s15 = sadd.s32 1, %s487_s13  ;;  %p414_p0 = scmp.ge.s32.totalorder %s491_s14, 1  ;;  %s491_s14 = sphi %s518_s14, %s13_s14   ;;  %s487_s13 = sphi %s516_s13, %s562_s13   ;;  %s483_s12 = sphi %s514_s12, %s561_s12  }
   0x3   : > { %p27_p1 = scmp.ge.s32.totalorder %s25_s15, 2  ;;  %p156_p2 = scmp.lt.s32.totalorder %s491_s14, 3 }
   0x5   : > { %s564_s15 = smov (%p27_p1, %s25_s15), 0  ;;  %p157_p3 = pnand %p414_p0, %p156_p2 }
   0x6   : > { %p185_p4 = scmp.lt.s32.totalorder (!%p157_p3), %s483_s12, 1  ;;  %v201_v0 = vld [vmem:[%s557_s0] sm:$0xff] (!%p157_p3)  ;;  %vm286_vm0 = vcmask (!%p157_p3), 130048   ;;  %v493_v2 = vmov (!%p157_p3), 0  }
   0x7   : > { %160 = sbr.rel (%p157_p3) target bundleno = 273 (0x111), region = 32  ;;  %v220_v1 = vld [vmem:[%s558_s1] sm:$0xff] (!%p157_p3)  ;;  %290 = vmatprep.subr.bf16.mxu0 (!%p157_p3), %v493_v2  ;;  %v418_v3 = vcombine.high (!%p157_p3), %v201_v0, %v201_v0  ;;  %457 = vset.pattern.permute.xlu0 (!%p157_p3), %v493_v2  ;;  %v417_v13 = vcombine.low (!%p157_p3), %v201_v0, %v201_v0 }
   0x8   : > { %223 = vperm.xlu0 (!%p157_p3), %457, %v220_v1  }
   0x9   : > { %428 = vmatprep.mubr.msk.bf16.mxu0 (!%p157_p3), %vm286_vm0, %v418_v3 }
   0xe   : > { %s566_s12 = smov (!%p185_p4, %s483_s12), 1 }
   0xf   : > { %s431_s20 = smul.u32 72, %s566_s12  ;;  %s416_s24 = sshll.u32 %s566_s12, 2 }
  0x10   : > { %s199_s27 = scalar_lea.vmem %s560_s3, %s416_s24 }
  0x11   : > { %s192_s23 = scalar_lea.vmem %s559_s2, %s431_s20 }
  0x12   : > { %v458_v4 = vld [vmem:[%s192_s23] sm:$0xff]   ;;  %v459_v5 = vld [vmem:[%s192_s23 + $0x8] sm:$0xff]   ;;  %v460_v6 = vld [vmem:[%s192_s23 + $0x10] sm:$0xff]  }
  0x13   : > { %291 = vmatpush1.bf16.msra.mxu0 %v458_v4  ;;  %v461_v7 = vld [vmem:[%s192_s23 + $0x18] sm:$0xff]   ;;  %v462_v8 = vld [vmem:[%s192_s23 + $0x20] sm:$0xff]   ;;  %v463_v9 = vld [vmem:[%s192_s23 + $0x28] sm:$0xff]  }
  0x14   : > { %292 = vmatprep.subr.bf16.mxu0 %v493_v2  ;;  %v464_v10 = vld [vmem:[%s192_s23 + $0x30] sm:$0xff]   ;;  %v465_v11 = vld [vmem:[%s192_s23 + $0x38] sm:$0xff]   ;;  %v466_v12 = vld [vmem:[%s192_s23 + $0x40] sm:$0xff]  }
  0x17   : > { %293 = vmatpush1.bf16.msra.mxu0 %v459_v5 }
  0x18   : > { %294 = vmatprep.subr.bf16.mxu0 %v493_v2 }
  0x1b   : > { %295 = vmatpush1.bf16.msra.mxu0 %v460_v6 }
  0x1c   : > { %296 = vmatprep.subr.bf16.mxu0 %v493_v2 }
  0x1f   : > { %297 = vmatpush1.bf16.msra.mxu0 %v461_v7 }
  0x20   : > { %298 = vmatprep.subr.bf16.mxu0 %v493_v2 }
  0x23   : > { %299 = vmatpush1.bf16.msra.mxu0 %v462_v8 }
  0x24   : > { %300 = vmatprep.subr.bf16.mxu0 %v493_v2 }
  0x27   : > { %301 = vmatpush1.bf16.msra.mxu0 %v463_v9 }
  0x28   : > { %302 = vmatprep.subr.bf16.mxu0 %v493_v2 }
  0x2b   : > { %303 = vmatpush1.bf16.msra.mxu0 %v464_v10 }
  0x2c   : > { %304 = vmatprep.subr.bf16.mxu0 %v493_v2 }
  0x2f   : > { %305 = vmatpush1.bf16.msra.mxu0 %v465_v11 }
  0x30   : > { %306 = vmatprep.subr.bf16.mxu0 %v493_v2 }
  0x33   : > { %307 = vmatpush1.bf16.msra.mxu0 %v466_v12 }
  0x36   : > { %323 = vmatmul.mubr.bf16.vlgmr.msra.gmra.mrb[0].mxu0 %v417_v13 }
  0x87   : > { %v224_v14 = vpop.permute.xlu0 %223 }
 0x109   : > { %v324_v15 = vpop.f32.mrb[0].mxu0 }
 0x10a   : > { %v325_v16 = vadd.f32 %v324_v15, %v224_v14  ;;  %v326_v17 = vpop.f32.mrb[1].mxu0 }
 0x10b   : > { %v327_v18 = vpop.f32.mrb[2].mxu0 }
 0x10c   : > { %v330_v19 = vmax.f32 %v325_v16, 0.0  ;;  %v328_v20 = vpop.f32.mrb[3].mxu0 }
 0x10e   : > { %v331_v21 = vpack.c.bf16 %v330_v19, %v330_v19 }
 0x110   : > { %332 = vst [vmem:[%s199_s27] sm:$0xf] %v331_v21 }
 0x111 PF: > { %s13_s14 = sadd.s32 1, %s491_s14   ;;  %s561_s12 = smov %s487_s13 }
 0x112   : > { %p10_p5 = scmp.ge.s32.totalorder %s13_s14, 4   ;;  %s562_s13 = smov %s564_s15 }
 0x114   :  { %12 = sbr.rel (!%p10_p5) target bundleno = 2 (0x2), region = 62 }

// kernel: model_forward.8
= control target key start
LH: loop header
LB: loop body
LE: loop exit
PB: predicated region body
PF: predicated region fallthrough
CT: control target
= control target key end

     0   :  { %s422_s12 = smov 0   ;;  %s424_s13 = smov 0   ;;  %s461_s0 = inlined_call_operand.vmem [shape: bf16[5,8], index: 0, kind: input, shape index: {}]   ;;  %s462_s1 = inlined_call_operand.vmem [shape: f32[5,1], index: 1, kind: input, shape index: {}]   ;;  %s463_s2 = inlined_call_operand.vmem [shape: bf16[2,8,128], index: 2, kind: input, shape index: {}]   ;;  %s464_s3 = inlined_call_operand.vmem [shape: f32[2,5,128], index: 3, kind: output, shape index: {}]  }
   0x1   :  { %s426_s14 = smov 0  }
   0x2 LB: > { %s25_s15 = sadd.s32 1, %s393_s13  ;;  %p333_p0 = scmp.ge.s32.totalorder %s397_s14, 1  ;;  %s397_s14 = sphi %s426_s14, %s13_s14   ;;  %s393_s13 = sphi %s424_s13, %s466_s13   ;;  %s389_s12 = sphi %s422_s12, %s465_s12  }
   0x3   : > { %p27_p1 = scmp.ge.s32.totalorder %s25_s15, 2  ;;  %p155_p2 = scmp.lt.s32.totalorder %s397_s14, 3 }
   0x5   : > { %s468_s15 = smov (%p27_p1, %s25_s15), 0  ;;  %p156_p3 = pnand %p333_p0, %p155_p2 }
   0x6   : > { %p183_p4 = scmp.lt.s32.totalorder (!%p156_p3), %s389_s12, 1  ;;  %v399_v0 = vmov (!%p156_p3), 0.0   ;;  %vm400_vm0 = vmmov (!%p156_p3), 0   ;;  %v200_v1 = vld [vmem:[%s462_s1] sm:$0x1f] (!%p156_p3)  ;;  %v401_v2 = vmov (!%p156_p3), 0  }
   0x7   : > { %159 = sbr.rel (%p156_p3) target bundleno = 237 (0xed), region = 32  ;;  %341 = vmatprep.subr.bf16.mxu0 (!%p156_p3), %v399_v0  ;;  %343 = vmatprep.mubr.msk.bf16.mxu0 (!%p156_p3), %vm400_vm0, %v399_v0  ;;  %vm210_vm1 = vcmask (!%p156_p3), 1043456   ;;  %v198_v5 = vld [vmem:[%s461_s0] sm:$0x7] (!%p156_p3)  ;;  %vm206_vm2 = vcmask (!%p156_p3), 64512  }
   0x8   : > { %374 = vset.pattern.permute.xlu0 (!%p156_p3), %v401_v2 }
   0x9   : > { %203 = vperm.xlu0 (!%p156_p3), %374, %v200_v1  }
   0xe   : > { %s470_s12 = smov (!%p183_p4, %s389_s12), 1 }
   0xf   : > { %s334_s18 = sshll.u32 %s470_s12, 2  ;;  %s335_s24 = sshll.u32 %s470_s12, 3 }
  0x10   : > { %s189_s21 = scalar_lea.vmem %s463_s2, %s334_s18  ;;  %s196_s27 = scalar_lea.vmem %s464_s3, %s335_s24 }
  0x11   : > { %v199_v3 = vld [vmem:[%s189_s21] sm:$0xf] }
  0x12   : > { %v212_v4 = vsel %vm210_vm1, %v199_v3, 0 }
  0x13   : > { %342 = vmatpush3.bf16.msra.mxu0 %v212_v4 }
  0x16   : > { %344 = vmatmul.mubr.msk.bf16.vlgmr.msra.gmra.mrb[0].mxu0 %vm206_vm2, %v198_v5 }
  0x88   : > { %v204_v6 = vpop.permute.xlu0 %203 }
  0xe9   : > { %v248_v7 = vpop.f32.mrb[0].mxu0 }
  0xea   : > { %v249_v8 = vadd.f32 %v248_v7, %v204_v6  ;;  %v345_v9 = vpop.f32.mrb[1].mxu0 }
  0xeb   : > { %v251_v10 = vpop.f32.mrb[2].mxu0 }
  0xec   : > { %254 = vst [vmem:[%s196_s27] sm:$0x1f] %v249_v8  ;;  %v346_v11 = vpop.f32.mrb[3].mxu0 }
  0xed PF: > { %s13_s14 = sadd.s32 1, %s397_s14   ;;  %s465_s12 = smov %s393_s13 }
  0xee   : > { %p10_p5 = scmp.ge.s32.totalorder %s13_s14, 4   ;;  %s466_s13 = smov %s468_s15 }
  0xf0   :  { %12 = sbr.rel (!%p10_p5) target bundleno = 2 (0x2), region = 62 }

// kernel: model_forward.9
= control target key start
LH: loop header
LB: loop body
LE: loop exit
PB: predicated region body
PF: predicated region fallthrough
CT: control target
= control target key end

     0   :  { %8 = vsyncpa [#allocation3], 0  ;;  %s1450_s0 = inlined_call_operand.vmem [shape: f32[16,4], index: 0, kind: input, shape index: {}]   ;;  %s1451_s1 = inlined_call_operand.vmem [shape: f32[4,16], index: 1, kind: input, shape index: {}]   ;;  %s1452_s2 = inlined_call_operand.vmem [shape: f32[2,5,4,4], index: 2, kind: input, shape index: {}]   ;;  %s1453_s3 = inlined_call_operand.hbm [shape: f32[2,5,16,16], index: 3, kind: output, shape index: {}]  }
   0x1   :  { %10 = vsyncpa [#allocation3 + $0x1], 0  ;;  %s1293_s12 = smov 0   ;;  %s1295_s13 = smov 0  }
   0x2   :  { %s1297_s14 = smov 0   ;;  %s1299_s15 = smov 0  }
   0x3 LB: > { %s1314_s16 = sadd.s32 4294967295, %s1266_s15   ;;  %s1038_s17 = sadd.s32 4294967294, %s1266_s15   ;;  %s1266_s15 = sphi %s1299_s15, %s1459_s15   ;;  %s1262_s14 = sphi %s1297_s14, %s1458_s14   ;;  %s1258_s13 = sphi %s1295_s13, %s1457_s13   ;;  %s1254_s12 = sphi %s1293_s12, %s1456_s12  }
   0x4   : > { %s1318_s18 = sadd.s32 1, %s1266_s15   ;;  %s91_s19 = sadd.s32 1, %s1262_s14 }
   0x5   : > { %s88_s20 = ssub.s32 %s1266_s15, %s1318_s18  ;;  %p101_p0 = scmp.ne.s32.totalorder %s1262_s14, %s1258_s13 }
   0x6   : > { %p89_p1 = scmp.eq.s32.totalorder %s88_s20, 0  ;;  %p102_p2 = scmp.eq.s32.totalorder %s1314_s16, 1 }
   0x7   : > { %p107_p3 = scmp.ne.s32.totalorder %s1258_s13, %s1254_s12  ;;  %p108_p4 = scmp.eq.s32.totalorder %s1038_s17, 1 }
   0x8   : > { %s1329_s21 = scalar_select %p89_p1, %s1262_s14, %s91_s19  }
   0x9   : > { %p1331_p5 = por %p102_p2, %p101_p0  ;;  %p1335_p6 = por %p108_p4, %p107_p3 }
   0xa   : > { %p1041_p7 = scmp.ge.s32.totalorder %s1266_s15, 1  ;;  %p140_p8 = scmp.lt.s32.totalorder %s1266_s15, 3 }
   0xc   : > { %p141_p9 = pnand %p1041_p7, %p140_p8 }
   0xd   : > { %v171_v0 = vld [vmem:[%s1451_s1] sm:$0xf] (!%p141_p9)  ;;  %vm177_vm0 = vcmask (!%p141_p9), 1043456   ;;  %p164_p10 = scmp.lt.s32.totalorder (!%p141_p9), %s1314_s16, 1  ;;  %v1268_v1 = vmov (!%p141_p9), 0.0   ;;  %vm1269_vm1 = vmmov (!%p141_p9), 0  }
   0xe   : > { %144 = sbr.rel (%p141_p9) target bundleno = 485 (0x1e5), region = 32  ;;  %1108 = vmatprep.subr.mxu0 (!%p141_p9), %v1268_v1  ;;  %1110 = vmatprep.mubr.msk.f32.mxu0 (!%p141_p9), %vm1269_vm1, %v1268_v1  ;;  %vm173_vm2 = vcmask (!%p141_p9), 31744   ;;  %v169_v7 = vld [vmem:[%s1450_s0] sm:$0xff] (!%p141_p9)  ;;  %v170_v9 = vld [vmem:[%s1450_s0 + $0x8] sm:$0xff] (!%p141_p9)  ;;  %s161_s8 = sand.u32 (!%p141_p9), 1, %s1258_s13   ;;  %vm335_vm3 = vcmask (!%p141_p9), 130048  }
   0xf   : > { %1109 = vmatpush3.msk.msra.mxu0 (!%p141_p9), %vm177_vm0, %v171_v0  ;;  %1115 = vmatprep.mubr.msk.f32.mxu1 (!%p141_p9), %vm173_vm2, %v169_v7  ;;  %s1158_s9 = smul.u32 (!%p141_p9), 80, %s161_s8 }
  0x10   : > { %1118 = vmatprep.subr.mxu0 (!%p141_p9), %v1268_v1  ;;  %s1160_s11 = smul.u32 (!%p141_p9), 1280, %s1314_s16 }
  0x11   : > { %s163_s10 = scalar_lea.vmem (!%p141_p9), [#allocation2], %s1158_s9 }
  0x12   : > { %s976_s17 = sshll.u32 (!%p141_p9), %s163_s10, 4  ;;  %s1403_s24 = scalar_lea.hbm (!%p141_p9), %s1453_s3, %s1160_s11  ;;  %s1405_s17 = int_to_ptr.vmem [resolvable:$true] %s976_s17 }
  0x13   : > { %s1204_s25 = scalar_lea.vmem (!%p141_p9), %s1405_s17, 1280 }
  0x14   : > { %p1205_p11 = scmp.ne.s32.totalorder (!%p141_p9), %s1405_s17, %s1204_s25 }
  0x15   : > { %s165_s26 = scalar_select %p164_p10, %s1314_s16, 1 }
  0x16   : > { %s1409_s16 = scalar_lea.sflag [#allocation3], %s161_s8  ;;  %p1206_p12 = pnand %p1205_p11, %p1331_p5 }
  0x17   : > { %s1159_s27 = smul.u32 20, %s165_s26  ;;  %s1270_s26 = smov [#allocation2]  }
  0x18   : > { %p1207_p13 = pneg %p1206_p12 }
  0x19   : > { %s168_s30 = scalar_lea.vmem %s1452_s2, %s1159_s27  ;;  %s1208_s27 = sshll.u32 %s1270_s26, 4  ;;  %s1209_s27 = int_to_ptr.vmem [resolvable:$false] %s1208_s27 }
  0x1a   : > { %v172_v2 = vld [vmem:[%s168_s30] sm:$0xf]  ;;  %v1048_v3 = vld [vmem:[%s168_s30 + $0x4] sm:$0xf]  ;;  %v1056_v4 = vld [vmem:[%s168_s30 + $0x8] sm:$0xf]  ;;  %p1211_p0 = scmp.lt.s32.totalorder %s1405_s17, %s1209_s27 }
  0x1b   : > { %1111 = vmatmul.mubr.msk.f32.vlgmr.msra.gmra.mrb[0].mxu0 %vm173_vm2, %v172_v2  ;;  %v1064_v5 = vld [vmem:[%s168_s30 + $0xc] sm:$0xf]  ;;  %v1072_v6 = vld [vmem:[%s168_s30 + $0x10] sm:$0xf]  ;;  %s1210_s28 = scalar_lea.vmem %s1209_s27, 2560 }
  0x1c   : > { %1119 = vmatpush3.msk.msra.mxu0 %vm177_vm0, %v171_v0  ;;  %1120 = vmatprep.mubr.msk.f32.mxu0 %vm1269_vm1, %v1268_v1  ;;  %p1212_p1 = scmp.lt.s32.totalorder %s1210_s28, %s1204_s25 }
  0x1d   : > { %1128 = vmatprep.subr.mxu0 %v1268_v1 }
  0x1e   : > { %p1213_p2 = por %p1212_p1, %p1211_p0 }
  0x1f   : > { %1121 = vmatmul.mubr.msk.f32.vlgmr.msra.gmra.mrb[2].mxu0 %vm173_vm2, %v1048_v3 }
  0x20   : > { %1129 = vmatpush3.msk.msra.mxu0 %vm177_vm0, %v171_v0  ;;  %1130 = vmatprep.mubr.msk.f32.mxu0 %vm1269_vm1, %v1268_v1  ;;  %p1214_p3 = pnand %p1213_p2, %p1207_p13 }
  0x21   : > { %1138 = vmatprep.subr.mxu0 %v1268_v1 }
  0x23   : > { %1131 = vmatmul.mubr.msk.f32.vlgmr.msra.gmra.mrb[4].mxu0 %vm173_vm2, %v1056_v4 }
  0x24   : > { %1139 = vmatpush3.msk.msra.mxu0 %vm177_vm0, %v171_v0  ;;  %1140 = vmatprep.mubr.msk.f32.mxu0 %vm1269_vm1, %v1268_v1 }
  0x25   : > { %1148 = vmatprep.subr.mxu0 %v1268_v1 }
  0x27   : > { %1141 = vmatmul.mubr.msk.f32.vlgmr.msra.gmra.mrb[6].mxu0 %vm173_vm2, %v1064_v5 }
  0x28   : > { %1149 = vmatpush3.msk.msra.mxu0 %vm177_vm0, %v171_v0  ;;  %1150 = vmatprep.mubr.msk.f32.mxu0 %vm1269_vm1, %v1268_v1 }
  0x2b   : > { %1151 = vmatmul.mubr.msk.f32.vlgmr.msra.gmra.mrb[8].mxu0 %vm173_vm2, %v1072_v6 }
  0xee   : > { %v247_v8 = vpop.f32.mrb[0].mxu0 }
  0xef   : > { %v1112_v10 = vpop.f32.mrb[1].mxu0  ;;  %1113 = vmatprep.subr.msk.mxu1 %vm177_vm0, %v247_v8 }
  0xf0   : > { %1114 = vmatpush3.msk.msra.mxu1 %vm177_vm0, %v247_v8 }
  0xf1   : > { %1116 = vmatmul.mubr.msk.f32.vlgmr.msra.gmra.mrb[0].mxu1 %vm173_vm2, %v170_v9 }
  0xf2   : > { %v409_v11 = vpop.f32.mrb[2].mxu0  ;;  %1125 = vmatprep.mubr.msk.f32.mxu1 %vm173_vm2, %v169_v7 }
  0xf3   : > { %v1122_v12 = vpop.f32.mrb[3].mxu0  ;;  %1123 = vmatprep.subr.msk.mxu1 %vm177_vm0, %v409_v11 }
  0xf4   : > { %1124 = vmatpush3.msk.msra.mxu1 %vm177_vm0, %v409_v11 }
  0xf5   : > { %1126 = vmatmul.mubr.msk.f32.vlgmr.msra.gmra.mrb[2].mxu1 %vm173_vm2, %v170_v9 }
  0xf6   : > { %v565_v13 = vpop.f32.mrb[4].mxu0  ;;  %1135 = vmatprep.mubr.msk.f32.mxu1 %vm173_vm2, %v169_v7 }
  0xf7   : > { %v1132_v14 = vpop.f32.mrb[5].mxu0  ;;  %1133 = vmatprep.subr.msk.mxu1 %vm177_vm0, %v565_v13 }
  0xf8   : > { %1134 = vmatpush3.msk.msra.mxu1 %vm177_vm0, %v565_v13 }
  0xf9   : > { %1136 = vmatmul.mubr.msk.f32.vlgmr.msra.gmra.mrb[4].mxu1 %vm173_vm2, %v170_v9 }
  0xfa   : > { %v721_v15 = vpop.f32.mrb[6].mxu0  ;;  %1145 = vmatprep.mubr.msk.f32.mxu1 %vm173_vm2, %v169_v7 }
  0xfb   : > { %v1142_v16 = vpop.f32.mrb[7].mxu0  ;;  %1143 = vmatprep.subr.msk.mxu1 %vm177_vm0, %v721_v15 }
  0xfc   : > { %1144 = vmatpush3.msk.msra.mxu1 %vm177_vm0, %v721_v15 }
  0xfd   : > { %1146 = vmatmul.mubr.msk.f32.vlgmr.msra.gmra.mrb[6].mxu1 %vm173_vm2, %v170_v9 }
  0xfe   : > { %v877_v17 = vpop.f32.mrb[8].mxu0  ;;  %1155 = vmatprep.mubr.msk.f32.mxu1 %vm173_vm2, %v169_v7 }
  0xff   : > { %v1152_v18 = vpop.f32.mrb[9].mxu0  ;;  %1153 = vmatprep.subr.msk.mxu1 %vm177_vm0, %v877_v17 }
 0x100   : > { %1154 = vmatpush3.msk.msra.mxu1 %vm177_vm0, %v877_v17 }
 0x101   : > { %1156 = vmatmul.mubr.msk.f32.vlgmr.msra.gmra.mrb[8].mxu1 %vm173_vm2, %v170_v9 }
 0x1c4   : > { %v1117_v19 = vpop.f32.mrb[0].mxu1 }
 0x1c5   : > { %337 = vst.msk [vmem:[%s163_s10 + $0x8] sm:$0xff] %vm335_vm3, %v1117_v19  ;;  %v326_v20 = vpop.f32.mrb[1].mxu1 }
 0x1c6   : > { %336 = vst.msk [vmem:[%s163_s10] sm:$0xff] %vm335_vm3, %v326_v20 }
 0x1c8   : > { %v1127_v21 = vpop.f32.mrb[2].mxu1 }
 0x1c9   : > { %1055 = vst.msk [vmem:[%s163_s10 + $0x18] sm:$0xff] %vm335_vm3, %v1127_v21  ;;  %v482_v22 = vpop.f32.mrb[3].mxu1 }
 0x1ca   : > { %1054 = vst.msk [vmem:[%s163_s10 + $0x10] sm:$0xff] %vm335_vm3, %v482_v22 }
 0x1cc   : > { %v1137_v23 = vpop.f32.mrb[4].mxu1 }
 0x1cd   : > { %1063 = vst.msk [vmem:[%s163_s10 + $0x28] sm:$0xff] %vm335_vm3, %v1137_v23  ;;  %v638_v24 = vpop.f32.mrb[5].mxu1 }
 0x1ce   : > { %1062 = vst.msk [vmem:[%s163_s10 + $0x20] sm:$0xff] %vm335_vm3, %v638_v24 }
 0x1d0   : > { %v1147_v25 = vpop.f32.mrb[6].mxu1 }
 0x1d1   : > { %1071 = vst.msk [vmem:[%s163_s10 + $0x38] sm:$0xff] %vm335_vm3, %v1147_v25  ;;  %v794_v26 = vpop.f32.mrb[7].mxu1 }
 0x1d2   : > { %1070 = vst.msk [vmem:[%s163_s10 + $0x30] sm:$0xff] %vm335_vm3, %v794_v26 }
 0x1d4   : > { %v1157_v27 = vpop.f32.mrb[8].mxu1 }
 0x1d5   : > { %1079 = vst.msk [vmem:[%s163_s10 + $0x48] sm:$0xff] %vm335_vm3, %v1157_v27  ;;  %v950_v28 = vpop.f32.mrb[9].mxu1 }
 0x1d6   : > { %1078 = vst.msk [vmem:[%s163_s10 + $0x40] sm:$0xff] %vm335_vm3, %v950_v28 }
 0x1d7   : > { %1217 = shalt.err (!%p1214_p3)
}
 0x1d8   : > { %s1218_s29 = scalar_lea.hbm %s1403_s24, 1280  ;;  %s1222_s5 = scalar_lea.hbm %s1453_s3, 2560 }
 0x1d9   : > { %p1219_p4 = scmp.ne.s32.totalorder %s1403_s24, %s1218_s29  ;;  %p1223_p9 = scmp.lt.u32.totalorder %s1403_s24, %s1453_s3 }
 0x1da   : > { %p1224_p10 = scmp.lt.u32.totalorder %s1222_s5, %s1218_s29  ;;  %p1226_p12 = scmp.lt.u32.totalorder %s1218_s29, %s1403_s24 }
 0x1db   : > { %p1220_p7 = pnand %p1219_p4, %p1331_p5 }
 0x1dc   : > { %p1225_p11 = por %p1224_p10, %p1223_p9 }
 0x1dd   : > { %p1221_p8 = pneg %p1220_p7 }
 0x1de   : > { %p1227_p13 = por %p1226_p12, %p1225_p11 }
 0x1e0   : > { %p1228_p0 = pnand %p1227_p13, %p1221_p8 }
 0x1e2   : > { %1231 = shalt.err (!%p1228_p0)
}
 0x1e3   : > { %s1271_s8 = smov 128   ;;  %s1272_s9 = smov 8  }
 0x1e4   : > { %1161 = dma.vmem_to_hbm [thread:$0]  (%p1331_p5), %s1405_s17, 1280, %s1403_s24, %s1409_s16, %s1271_s8, %s1271_s8, %s1272_s9  }
 0x1e5 PF: > { %p1167_p1 = scmp.ge.s32.totalorder %s1266_s15, 2  ;;  %s991_s10 = sand.u32 1, %s1254_s12  }
 0x1e6   : > { %s992_s11 = scalar_lea.sflag [#allocation3], %s991_s10 }
 0x1e7   : > { %p1164_p2 = pnand %p1167_p1, %p1335_p6 }
 0x1e9   : > { %1249 = dma.done.wait (!%p1164_p2), %s992_s11, 1280  }
 0x1ea   : > { %1251 = vsyncadd (!%p1164_p2), %s992_s11, 4294966016  ;;  %p13_p3 = scmp.ge.s32.totalorder %s1318_s18, 4   ;;  %s1456_s12 = smov %s1258_s13 }
 0x1eb   : > { %s1457_s13 = smov %s1262_s14  ;;  %s1458_s14 = smov %s1329_s21 }
 0x1ec   : > { %s1459_s15 = smov %s1318_s18  ;;  %15 = sbr.rel (!%p13_p3) target bundleno = 3 (0x3), region = 75 }
 0x1f3   :  { %997 = vsyncpa [#allocation3], 1 }
 0x1f4   :  { %999 = vsyncpa [#allocation3 + $0x1], 1 }

</bundles_post_ra>
